<compile_context>
chip_gen: v6e
topology: v6e:2x2x1
jax: 0.10.0
libtpu: 0.0.40
codegen_flags: <defaults>
</compile_context>

<pallas_src>
import functools

import jax
import jax.numpy as jnp
from jax.experimental import pallas as pl
from jax.experimental.pallas import tpu as pltpu


def _focal_weight(one_minus_p, gamma):
    """(1 - p) ** gamma with VPU-friendly fast paths.

    Integer gamma -> repeated multiplies (pure VPU).
    Half-integer  -> integer part * sqrt(1 - p) (one EUP sqrt).
    Anything else -> generic pow (exp+log on the lone EUP slot; slow path).
    """
    g2 = float(gamma) * 2.0
    if g2 >= 0.0 and g2 == int(g2):
        n_int, has_half = divmod(int(g2), 2)
        w = None
        if has_half:
            w = jnp.sqrt(jnp.maximum(one_minus_p, 0.0))
        for _ in range(n_int):
            w = one_minus_p if w is None else w * one_minus_p
        if w is None:                       # gamma == 0
            w = jnp.ones_like(one_minus_p)
        return w
    # TODO(synk): non-half-integer gamma uses the generic pow (exp+log on the
    # single EUP slot) and is the slow path.
    return jnp.maximum(one_minus_p, 0.0) ** gamma


def _focal_loss_kernel(logits_ref, targets_ref, out_ref, *, gamma, nfold, nclass):
    """One (block_rows, nfold * nclass) tile -> one partial loss sum.

    `nfold` original (1, nclass) rows are packed side by side along the lane
    axis, so the heavy element-wise / exp work is lane-dense.  Per-original-row
    reductions use static lane slices (compact (tb, 1) columns); the per-row
    scalars are stitched back with a single concat.
    """
    x = logits_ref[...]
    t = targets_ref[...]
    if x.dtype != jnp.float32:
        x = x.astype(jnp.float32)
    if t.dtype != jnp.float32:
        t = t.astype(jnp.float32)
    tb = x.shape[0]

    def seg_slices(arr):
        return [arr[:, j * nclass:(j + 1) * nclass] for j in range(nfold)]

    def seg_expand(cols):
        # cols: nfold x (tb, 1) per-row scalars -> broadcastable full-width map.
        if nfold == 1:
            return cols[0]                  # (tb, 1) broadcasts along lanes
        return jnp.concatenate(
            [jnp.broadcast_to(c, (tb, nclass)) for c in cols], axis=1)

    # Numerically stable log-softmax along each original row (dim=1).
    m = seg_expand([jnp.max(xs, axis=1, keepdims=True) for xs in seg_slices(x)])
    shifted = x - m
    e = jnp.exp(shifted)                    # single EUP pass, lane-dense
    s_cols = [jnp.sum(es, axis=1, keepdims=True) for es in seg_slices(e)]
    # log / reciprocal only on the compact per-row sums (nclass x fewer elems).
    log_s = seg_expand([jnp.log(sc) for sc in s_cols])
    inv_s = seg_expand([1.0 / sc for sc in s_cols])

    neg_log_probs = log_s - shifted         # == -log_softmax(x); no extra negate
    probs = e * inv_s                       # no second exp
    focal_weight = _focal_weight(1.0 - probs, gamma)
    loss = t * focal_weight * neg_log_probs  # the two minus signs cancel

    # Partial sum for this block (zero-padded rows have zero targets -> 0 loss).
    # TODO(synk): this lane+sublane reduce could be offloaded to the idle MXU
    # (jnp.dot(loss, ones((L, 1)), precision=HIGHEST)); kept on the XLU to
    # avoid any bf16 MXU rounding of the f32 partials.
    out_ref[...] = jnp.broadcast_to(jnp.sum(loss), out_ref.shape)


def _auto_block_rows(lane_width, in_itemsize, vmem_limit_bytes):
    """Byte-budgeted batch tile: 2 inputs x 2 pipeline buffers at the input
    itemsize plus ~12 live f32 intermediates, within ~2/3 of the VMEM limit."""
    per_row = 2 * 2 * lane_width * in_itemsize + 12 * lane_width * 4
    usable = (vmem_limit_bytes * 2) // 3
    return max(8, (usable // per_row) // 8 * 8)


def focal_loss(logits, targets, *, gamma=2.0, reduction="mean",
               block_rows=None, vmem_limit_bytes=32 * 1024 * 1024):
    """Soft-label focal loss. logits/targets: (B, C); reduction 'mean' | 'sum'.

    Inputs may be bf16 (halves HBM traffic); compute is f32 inside the kernel.
    The 32 MiB VMEM default is sized for v7x; v5e/v6e callers may raise it.
    """
    B, C = logits.shape
    assert targets.shape == (B, C)
    assert reduction in ("mean", "sum")
    # TODO(synk): reduction='none' (per-element loss output) not implemented.

    # Lane folding for small class counts: pack k = 128 // C original rows per
    # 128-lane vreg row (zero-cost row-major reshape in HBM).
    nfold = 128 // C if (8 <= C < 128 and 128 % C == 0) else 1
    lanes = nfold * C
    rows = -(-B // nfold)                                   # ceil

    in_itemsize = max(jnp.dtype(logits.dtype).itemsize,
                      jnp.dtype(targets.dtype).itemsize)
    if block_rows is None:
        block_rows = _auto_block_rows(lanes, in_itemsize, vmem_limit_bytes)
    block_rows = max(8, (block_rows // 8) * 8)
    if rows >= 16:
        # Keep at least 2 grid blocks so both v7x TensorCores get work.
        two_blocks = (((rows + 1) // 2) + 7) // 8 * 8
        block_rows = min(block_rows, two_blocks)
    block_rows = min(block_rows, ((rows + 7) // 8) * 8)

    rows_pad = ((rows + block_rows - 1) // block_rows) * block_rows
    num_blocks = rows_pad // block_rows
    b_pad = rows_pad * nfold
    if b_pad != B:
        # Padded rows are all-zero; zero targets -> exactly zero loss.
        pad = b_pad - B
        logits = jnp.pad(logits, ((0, pad), (0, 0)))
        targets = jnp.pad(targets, ((0, pad), (0, 0)))
    if nfold > 1:
        logits = logits.reshape(rows_pad, lanes)
        targets = targets.reshape(rows_pad, lanes)

    kernel = functools.partial(_focal_loss_kernel, gamma=gamma,
                               nfold=nfold, nclass=C)

    partials = pl.pallas_call(
        kernel,
        out_shape=jax.ShapeDtypeStruct((num_blocks, 8, 128), jnp.float32),
        grid_spec=pltpu.PrefetchScalarGridSpec(
            num_scalar_prefetch=0,
            grid=(num_blocks,),
            in_specs=[
                pl.BlockSpec((block_rows, lanes), lambda i: (i, 0)),
                pl.BlockSpec((block_rows, lanes), lambda i: (i, 0)),
            ],
            out_specs=pl.BlockSpec((1, 8, 128), lambda i: (i, 0, 0)),
        ),
        compiler_params=pltpu.CompilerParams(
            dimension_semantics=("parallel",),
            vmem_limit_bytes=vmem_limit_bytes,
        ),
    )(logits, targets)

    total = jnp.sum(partials[:, 0, 0])
    if reduction == "mean":
        return total / jnp.float32(B)
    return total


def _focal_loss_ref(logits, targets, gamma=2.0):
    """Pure-JAX reference mirroring the PyTorch module (reduction='mean')."""
    log_probs = jax.nn.log_softmax(logits.astype(jnp.float32), axis=1)
    probs = jnp.exp(log_probs)
    focal_weight = (1.0 - probs) ** gamma
    loss = -targets.astype(jnp.float32) * focal_weight * log_probs
    return jnp.mean(jnp.sum(loss, axis=1))


if __name__ == "__main__":
    key = jax.random.PRNGKey(0)
    k1, k2, k3, k4, k5, k6 = jax.random.split(key, 6)

    # Case 1: module-spec shapes (B, C) = (16, 32) -> lane-folded path (k=4).
    B, C = 16, 32
    logits = jax.random.normal(k1, (B, C), dtype=jnp.float32)
    targets = jax.nn.softmax(jax.random.normal(k2, (B, C), dtype=jnp.float32), axis=1)
    out = jax.block_until_ready(focal_loss(logits, targets, gamma=2.0))
    ref = _focal_loss_ref(logits, targets, gamma=2.0)
    assert jnp.allclose(out, ref, rtol=1e-5, atol=1e-5), (out, ref)

    # Case 2: batch not a multiple of the fold / tile -> zero-padding path.
    B2, C2 = 19, 32
    logits2 = jax.random.normal(k3, (B2, C2), dtype=jnp.float32)
    targets2 = jax.nn.softmax(jax.random.normal(k4, (B2, C2), dtype=jnp.float32), axis=1)
    out2 = jax.block_until_ready(focal_loss(logits2, targets2, gamma=2.0))
    ref2 = _focal_loss_ref(logits2, targets2, gamma=2.0)
    assert jnp.allclose(out2, ref2, rtol=1e-5, atol=1e-5), (out2, ref2)

    # Case 3: class count that cannot fold into 128 lanes -> generic fallback.
    B3, C3 = 12, 48
    logits3 = jax.random.normal(k5, (B3, C3), dtype=jnp.float32)
    targets3 = jax.nn.softmax(jax.random.normal(k6, (B3, C3), dtype=jnp.float32), axis=1)
    out3 = jax.block_until_ready(focal_loss(logits3, targets3, gamma=2.0))
    ref3 = _focal_loss_ref(logits3, targets3, gamma=2.0)
    assert jnp.allclose(out3, ref3, rtol=1e-5, atol=1e-5), (out3, ref3)

    print("KERNEL_OK")
</pallas_src>

<mosaic_0001>
module attributes {stable_mosaic.version = 11 : i64} {
  func.func @_focal_loss_kernel(%arg0: i32, %arg1: memref<8x128xf32, #tpu.memory_space<vmem>>, %arg2: memref<8x128xf32, #tpu.memory_space<vmem>>, %arg3: memref<1x8x128xf32, #tpu.memory_space<vmem>>) attributes {dimension_semantics = [#tpu.dimension_semantics<parallel>], iteration_bounds = array<i64: 1>, scalar_prefetch = 0 : i64, scratch_operands = 0 : i64, tpu.core_type = #tpu.core_type<tc>, window_params = [{transform_indices = @transform_0, window_bounds = array<i64: 8, 128>}, {transform_indices = @transform_1, window_bounds = array<i64: 8, 128>}, {transform_indices = @transform_2, window_bounds = array<i64: 1, 8, 128>}]} {
    %c0 = arith.constant 0 : index
    %c0_0 = arith.constant 0 : index
    %0 = vector.load %arg1[%c0, %c0_0] : memref<8x128xf32, #tpu.memory_space<vmem>>, vector<8x128xf32>
    %c0_1 = arith.constant 0 : index
    %c0_2 = arith.constant 0 : index
    %1 = vector.load %arg2[%c0_1, %c0_2] : memref<8x128xf32, #tpu.memory_space<vmem>>, vector<8x128xf32>
    %2 = vector.extract_strided_slice %0 {offsets = [0, 0], sizes = [8, 32], strides = [1, 1]} : vector<8x128xf32> to vector<8x32xf32>
    %3 = vector.extract_strided_slice %0 {offsets = [0, 32], sizes = [8, 32], strides = [1, 1]} : vector<8x128xf32> to vector<8x32xf32>
    %4 = vector.extract_strided_slice %0 {offsets = [0, 64], sizes = [8, 32], strides = [1, 1]} : vector<8x128xf32> to vector<8x32xf32>
    %5 = vector.extract_strided_slice %0 {offsets = [0, 96], sizes = [8, 32], strides = [1, 1]} : vector<8x128xf32> to vector<8x32xf32>
    %cst = arith.constant dense<0xFF800000> : vector<8xf32>
    %6 = vector.multi_reduction <maximumf>, %2, %cst [1] : vector<8x32xf32> to vector<8xf32>
    %7 = vector.shape_cast %6 : vector<8xf32> to vector<8x1xf32>
    %cst_3 = arith.constant dense<0xFF800000> : vector<8xf32>
    %8 = vector.multi_reduction <maximumf>, %3, %cst_3 [1] : vector<8x32xf32> to vector<8xf32>
    %9 = vector.shape_cast %8 : vector<8xf32> to vector<8x1xf32>
    %cst_4 = arith.constant dense<0xFF800000> : vector<8xf32>
    %10 = vector.multi_reduction <maximumf>, %4, %cst_4 [1] : vector<8x32xf32> to vector<8xf32>
    %11 = vector.shape_cast %10 : vector<8xf32> to vector<8x1xf32>
    %cst_5 = arith.constant dense<0xFF800000> : vector<8xf32>
    %12 = vector.multi_reduction <maximumf>, %5, %cst_5 [1] : vector<8x32xf32> to vector<8xf32>
    %13 = vector.shape_cast %12 : vector<8xf32> to vector<8x1xf32>
    %14 = vector.shape_cast %7 : vector<8x1xf32> to vector<8x1xf32>
    %15 = vector.broadcast %14 : vector<8x1xf32> to vector<8x32xf32>
    %16 = vector.shape_cast %9 : vector<8x1xf32> to vector<8x1xf32>
    %17 = vector.broadcast %16 : vector<8x1xf32> to vector<8x32xf32>
    %18 = vector.shape_cast %11 : vector<8x1xf32> to vector<8x1xf32>
    %19 = vector.broadcast %18 : vector<8x1xf32> to vector<8x32xf32>
    %20 = vector.shape_cast %13 : vector<8x1xf32> to vector<8x1xf32>
    %21 = vector.broadcast %20 : vector<8x1xf32> to vector<8x32xf32>
    %22 = tpu.concatenate %15, %17, %19, %21 in 1 : vector<8x32xf32>, vector<8x32xf32>, vector<8x32xf32>, vector<8x32xf32> -> vector<8x128xf32>
    %23 = arith.subf %0, %22 : vector<8x128xf32>
    %24 = math.exp %23 : vector<8x128xf32>
    %25 = vector.extract_strided_slice %24 {offsets = [0, 0], sizes = [8, 32], strides = [1, 1]} : vector<8x128xf32> to vector<8x32xf32>
    %26 = vector.extract_strided_slice %24 {offsets = [0, 32], sizes = [8, 32], strides = [1, 1]} : vector<8x128xf32> to vector<8x32xf32>
    %27 = vector.extract_strided_slice %24 {offsets = [0, 64], sizes = [8, 32], strides = [1, 1]} : vector<8x128xf32> to vector<8x32xf32>
    %28 = vector.extract_strided_slice %24 {offsets = [0, 96], sizes = [8, 32], strides = [1, 1]} : vector<8x128xf32> to vector<8x32xf32>
    %cst_6 = arith.constant dense<0.000000e+00> : vector<8xf32>
    %29 = vector.multi_reduction <add>, %25, %cst_6 [1] : vector<8x32xf32> to vector<8xf32>
    %30 = vector.shape_cast %29 : vector<8xf32> to vector<8x1xf32>
    %cst_7 = arith.constant dense<0.000000e+00> : vector<8xf32>
    %31 = vector.multi_reduction <add>, %26, %cst_7 [1] : vector<8x32xf32> to vector<8xf32>
    %32 = vector.shape_cast %31 : vector<8xf32> to vector<8x1xf32>
    %cst_8 = arith.constant dense<0.000000e+00> : vector<8xf32>
    %33 = vector.multi_reduction <add>, %27, %cst_8 [1] : vector<8x32xf32> to vector<8xf32>
    %34 = vector.shape_cast %33 : vector<8xf32> to vector<8x1xf32>
    %cst_9 = arith.constant dense<0.000000e+00> : vector<8xf32>
    %35 = vector.multi_reduction <add>, %28, %cst_9 [1] : vector<8x32xf32> to vector<8xf32>
    %36 = vector.shape_cast %35 : vector<8xf32> to vector<8x1xf32>
    %37 = math.log %30 : vector<8x1xf32>
    %38 = math.log %32 : vector<8x1xf32>
    %39 = math.log %34 : vector<8x1xf32>
    %40 = math.log %36 : vector<8x1xf32>
    %41 = vector.shape_cast %37 : vector<8x1xf32> to vector<8x1xf32>
    %42 = vector.broadcast %41 : vector<8x1xf32> to vector<8x32xf32>
    %43 = vector.shape_cast %38 : vector<8x1xf32> to vector<8x1xf32>
    %44 = vector.broadcast %43 : vector<8x1xf32> to vector<8x32xf32>
    %45 = vector.shape_cast %39 : vector<8x1xf32> to vector<8x1xf32>
    %46 = vector.broadcast %45 : vector<8x1xf32> to vector<8x32xf32>
    %47 = vector.shape_cast %40 : vector<8x1xf32> to vector<8x1xf32>
    %48 = vector.broadcast %47 : vector<8x1xf32> to vector<8x32xf32>
    %49 = tpu.concatenate %42, %44, %46, %48 in 1 : vector<8x32xf32>, vector<8x32xf32>, vector<8x32xf32>, vector<8x32xf32> -> vector<8x128xf32>
    %cst_10 = arith.constant 1.000000e+00 : f32
    %50 = vector.broadcast %cst_10 : f32 to vector<8x1xf32>
    %51 = arith.divf %50, %30 : vector<8x1xf32>
    %cst_11 = arith.constant 1.000000e+00 : f32
    %52 = vector.broadcast %cst_11 : f32 to vector<8x1xf32>
    %53 = arith.divf %52, %32 : vector<8x1xf32>
    %cst_12 = arith.constant 1.000000e+00 : f32
    %54 = vector.broadcast %cst_12 : f32 to vector<8x1xf32>
    %55 = arith.divf %54, %34 : vector<8x1xf32>
    %cst_13 = arith.constant 1.000000e+00 : f32
    %56 = vector.broadcast %cst_13 : f32 to vector<8x1xf32>
    %57 = arith.divf %56, %36 : vector<8x1xf32>
    %58 = vector.shape_cast %51 : vector<8x1xf32> to vector<8x1xf32>
    %59 = vector.broadcast %58 : vector<8x1xf32> to vector<8x32xf32>
    %60 = vector.shape_cast %53 : vector<8x1xf32> to vector<8x1xf32>
    %61 = vector.broadcast %60 : vector<8x1xf32> to vector<8x32xf32>
    %62 = vector.shape_cast %55 : vector<8x1xf32> to vector<8x1xf32>
    %63 = vector.broadcast %62 : vector<8x1xf32> to vector<8x32xf32>
    %64 = vector.shape_cast %57 : vector<8x1xf32> to vector<8x1xf32>
    %65 = vector.broadcast %64 : vector<8x1xf32> to vector<8x32xf32>
    %66 = tpu.concatenate %59, %61, %63, %65 in 1 : vector<8x32xf32>, vector<8x32xf32>, vector<8x32xf32>, vector<8x32xf32> -> vector<8x128xf32>
    %67 = arith.subf %49, %23 : vector<8x128xf32>
    %68 = arith.mulf %24, %66 : vector<8x128xf32>
    %cst_14 = arith.constant 1.000000e+00 : f32
    %69 = vector.broadcast %cst_14 : f32 to vector<8x128xf32>
    %70 = arith.subf %69, %68 : vector<8x128xf32>
    %71 = arith.mulf %70, %70 : vector<8x128xf32>
    %72 = arith.mulf %1, %71 : vector<8x128xf32>
    %73 = arith.mulf %72, %67 : vector<8x128xf32>
    %74 = vector.shape_cast %73 : vector<8x128xf32> to vector<1x8x128xf32>
    %cst_15 = arith.constant dense<0.000000e+00> : vector<1xf32>
    %75 = vector.multi_reduction <add>, %74, %cst_15 [1, 2] : vector<1x8x128xf32> to vector<1xf32>
    %76 = vector.shape_cast %75 : vector<1xf32> to vector<1x1x1xf32>
    %77 = vector.extract %76[0, 0, 0] : f32 from vector<1x1x1xf32>
    %78 = vector.broadcast %77 : f32 to vector<1x8x128xf32>
    %c0_16 = arith.constant 0 : index
    %c0_17 = arith.constant 0 : index
    %c0_18 = arith.constant 0 : index
    %79 = vector.load %arg3[%c0_16, %c0_17, %c0_18] : memref<1x8x128xf32, #tpu.memory_space<vmem>>, vector<1x8x128xf32>
    tpu.vector_store %arg3[%c0_16, %c0_17, %c0_18], %78 {strides = array<i32>} : memref<1x8x128xf32, #tpu.memory_space<vmem>>, vector<1x8x128xf32>,
    return
  }
  func.func @transform_0(%arg0: i32) -> (i32, i32) {
    %c0_i32 = arith.constant 0 : i32
    %c0_i32_0 = arith.constant 0 : i32
    return %arg0, %c0_i32 : i32, i32
  }
  func.func @transform_1(%arg0: i32) -> (i32, i32) {
    %c0_i32 = arith.constant 0 : i32
    %c0_i32_0 = arith.constant 0 : i32
    return %arg0, %c0_i32 : i32, i32
  }
  func.func @transform_2(%arg0: i32) -> (i32, i32, i32) {
    %c0_i32 = arith.constant 0 : i32
    %c0_i32_0 = arith.constant 0 : i32
    %c0_i32_1 = arith.constant 0 : i32
    return %arg0, %c0_i32, %c0_i32_0 : i32, i32, i32
  }
}

</mosaic_0001>

<bundles_post_ra>
// kernel: tpu_custom_call.1
= control target key start
LH: loop header
LB: loop body
LE: loop exit
PB: predicated region body
PF: predicated region fallthrough
CT: control target
= control target key end

     0   :  { %7 = vsyncpa [#allocation3], 0  ;;  %s275_s0 = inlined_call_operand.hbm [shape: f32[8,128], index: 0, kind: input, shape index: {}]   ;;  %s276_s1 = inlined_call_operand.hbm [shape: f32[8,128], index: 1, kind: input, shape index: {}]   ;;  %s277_s2 = inlined_call_operand.hbm [shape: f32[1,8,128], index: 2, kind: output, shape index: {}]  }
   0x1   :  { %8 = vsyncpa [#allocation6], 0 }
   0x2   :  { %9 = vsyncpa [#allocation4], 0  ;;  %s231_s9 = smov [#allocation2]   ;;  %s232_s11 = smov [#allocation5]  }
   0x3   :  { %s16_s10 = sshll.u32 %s231_s9, 4  ;;  %s26_s12 = sshll.u32 %s232_s11, 4  ;;  %s17_s10 = int_to_ptr.vmem [resolvable:$true] %s16_s10  ;;  %s27_s12 = int_to_ptr.vmem [resolvable:$true] %s26_s12 }
   0x4   :  { %s173_s13 = scalar_lea.vmem %s17_s10, 128  ;;  %p178_p1 = scmp.lt.s32.totalorder %s17_s10, %s17_s10 }
   0x5   :  { %p174_p0 = scmp.ne.s32.totalorder %s17_s10, %s173_s13  ;;  %p179_p2 = scmp.lt.s32.totalorder %s173_s13, %s173_s13 }
   0x7   :  { %p180_p3 = por %p179_p2, %p178_p1 }
   0x9   :  { %p181_p4 = pnand %p180_p3, %p174_p0 }
   0xb   :  { %184 = shalt.err (!%p181_p4)
}
   0xc   :  { %19 = dma.hbm_to_vmem [thread:$0]  %s275_s0, 128, %s17_s10, [#allocation3]  }
   0xd   :  { %s193_s16 = scalar_lea.vmem %s27_s12, 128  ;;  %p198_p6 = scmp.lt.s32.totalorder %s27_s12, %s27_s12 }
   0xe   :  { %p194_p5 = scmp.ne.s32.totalorder %s27_s12, %s193_s16  ;;  %p199_p7 = scmp.lt.s32.totalorder %s193_s16, %s193_s16 }
  0x10   :  { %p200_p8 = por %p199_p7, %p198_p6 }
  0x12   :  { %p201_p9 = pnand %p200_p8, %p194_p5 }
  0x14   :  { %204 = shalt.err (!%p201_p9)
}
  0x15   :  { %29 = dma.hbm_to_vmem [thread:$0]  %s276_s1, 128, %s27_s12, [#allocation6]  }
  0x16   :  { %225 = dma.done.wait [#allocation3], 128  }
  0x17   :  { %226 = vsyncadd [#allocation3], 4294967168 }
  0x18   :  { %227 = dma.done.wait [#allocation6], 128  }
  0x19   :  { %228 = vsyncadd [#allocation6], 4294967168  ;;  %vm38_vm0 = vcmask 261120   ;;  %vm46_vm1 = vcmask 785920   ;;  %v36_v0 = vld [vmem:[#allocation2] sm:$0xff]  ;;  %vm42_vm2 = vcmask 523520  }
  0x1a   :  { %vm50_vm3 = vcmask 1048320   ;;  %v39_v1 = vsel %vm38_vm0, %v36_v0, -inf  ;;  %v47_v2 = vsel %vm46_vm1, %v36_v0, -inf  ;;  %v43_v3 = vsel %vm42_vm2, %v36_v0, -inf  ;;  %s233_s0 = smov 64   ;;  %s234_s1 = smov 96  }
  0x1b   :  { %40 = vmax.xlane.f32.xlu0 %v39_v1  ;;  %48 = vmax.xlane.f32.xlu1 %v47_v2  ;;  %v51_v4 = vsel %vm50_vm3, %v36_v0, -inf  ;;  %vm55_vm4 = vcmask 523264   ;;  %vm57_vm5 = vcmask 785408   ;;  %s235_s19 = smov 32   ;;  %v37_v45 = vld [vmem:[#allocation5] sm:$0xff]  ;;  %s236_s20 = smov [#allocation7]  }
  0x1c   :  { %s129_s21 = sshll.u32 %s236_s20, 4  ;;  %s130_s21 = int_to_ptr.vmem [resolvable:$true] %s129_s21 }
  0x1d   :  { %s205_s23 = scalar_lea.vmem %s130_s21, 128  ;;  %p210_p11 = scmp.lt.s32.totalorder %s130_s21, %s130_s21 }
  0x1e   :  { %p206_p10 = scmp.ne.s32.totalorder %s130_s21, %s205_s23  ;;  %p211_p12 = scmp.lt.s32.totalorder %s205_s23, %s205_s23 }
  0x1f   :  { %44 = vmax.xlane.f32.xlu0 %v43_v3  ;;  %52 = vmax.xlane.f32.xlu1 %v51_v4 }
  0x20   :  { %p212_p13 = por %p211_p12, %p210_p11 }
  0x22   :  { %p213_p0 = pnand %p212_p13, %p206_p10 }
  0xa4   :  { %v41_v5 = vpop.xlane.xlu0 %40  ;;  %v49_v6 = vpop.xlane.xlu1 %48 }
  0xa8   :  { %v45_v7 = vpop.xlane.xlu0 %44  ;;  %v53_v8 = vpop.xlane.xlu1 %52 }
  0xa9   :  { %v54_v9 = vsel %vm38_vm0, %v41_v5, %v45_v7 }
  0xaa   :  { %v56_v10 = vsel %vm55_vm4, %v54_v9, %v49_v6 }
  0xab   :  { %v58_v11 = vsel %vm57_vm5, %v56_v10, %v53_v8 }
  0xac   :  { %v59_v12 = vsub.f32 %v36_v0, %v58_v11 }
  0xae   :  { %v60_v13 = vmul.f32 1.442695, %v59_v12 }
  0xb0   :  { %147 = vpow2.f32 %v60_v13 }
  0xbd   :  { %v148_v14 = vpop.eup %147 }
  0xbe   :  { %72 = vrot.lane.b32.xlu1 %v148_v14, %s233_s0  ;;  %66 = vrot.lane.b32.xlu0 %v148_v14, %s234_s1  ;;  %v62_v15 = vsel %vm38_vm0, %v148_v14, 0.0 }
  0xc2   :  { %78 = vrot.lane.b32.xlu1 %v148_v14, %s235_s19 }
  0xe6   :  { %63 = vadd.xlane.f32.xlu1 %v62_v15 }
 0x130   :  { %v73_v16 = vpop.permute.xlu1 %72  ;;  %v67_v17 = vpop.permute.xlu0 %66 }
 0x131   :  { %v69_v18 = vsel %vm38_vm0, %v67_v17, 0.0  ;;  %v75_v19 = vsel %vm38_vm0, %v73_v16, 0.0 }
 0x132   :  { %70 = vadd.xlane.f32.xlu0 %v69_v18 }
 0x134   :  { %v79_v20 = vpop.permute.xlu1 %78 }
 0x135   :  { %v81_v21 = vsel %vm38_vm0, %v79_v20, 0.0 }
 0x136   :  { %76 = vadd.xlane.f32.xlu0 %v75_v19 }
 0x13a   :  { %82 = vadd.xlane.f32.xlu0 %v81_v21 }
 0x16f   :  { %v64_v22 = vpop.xlane.xlu1 %63 }
 0x170   :  { %149 = vlog2.f32 %v64_v22 }
 0x17d   :  { %v150_v26 = vpop.eup %149 }
 0x17e   :  { %v85_v38 = vmul.f32 0.6931472, %v150_v26 }
 0x1bb   :  { %v71_v23 = vpop.xlane.xlu0 %70 }
 0x1bc   :  { %151 = vlog2.f32 %v71_v23 }
 0x1bd   :  { %153 = vrcp.f32 %v71_v23 }
 0x1bf   :  { %v77_v24 = vpop.xlane.xlu0 %76 }
 0x1c0   :  { %155 = vlog2.f32 %v77_v24 }
 0x1c1   :  { %157 = vrcp.f32 %v77_v24 }
 0x1c2   :  { %159 = vrcp.f32 %v64_v22 }
 0x1c3   :  { %v83_v25 = vpop.xlane.xlu0 %82 }
 0x1c4   :  { %161 = vlog2.f32 %v83_v25 }
 0x1c5   :  { %163 = vrcp.f32 %v83_v25 }
 0x1c9   :  { %v152_v27 = vpop.eup %151 }
 0x1ca   :  { %v154_v28 = vpop.eup %153  ;;  %v87_v33 = vmul.f32 0.6931472, %v152_v27 }
 0x1cc   :  { %v92_v42 = vsel %vm38_vm0, %v85_v38, %v87_v33 }
 0x1cd   :  { %v156_v29 = vpop.eup %155 }
 0x1ce   :  { %v158_v30 = vpop.eup %157  ;;  %v89_v36 = vmul.f32 0.6931472, %v156_v29 }
 0x1cf   :  { %v160_v31 = vpop.eup %159 }
 0x1d0   :  { %v103_v34 = vsel %vm38_vm0, %v160_v31, %v154_v28  ;;  %v93_v43 = vsel %vm55_vm4, %v92_v42, %v89_v36 }
 0x1d1   :  { %v162_v32 = vpop.eup %161  ;;  %v104_v37 = vsel %vm55_vm4, %v103_v34, %v158_v30 }
 0x1d2   :  { %v164_v35 = vpop.eup %163  ;;  %v91_v39 = vmul.f32 0.6931472, %v162_v32 }
 0x1d3   :  { %v105_v40 = vsel %vm57_vm5, %v104_v37, %v164_v35 }
 0x1d4   :  { %v107_v41 = vmul.f32 %v148_v14, %v105_v40  ;;  %v94_v46 = vsel %vm57_vm5, %v93_v43, %v91_v39 }
 0x1d5   :  { %v106_v48 = vsub.f32 %v94_v46, %v59_v12 }
 0x1d6   :  { %v108_v44 = vsub.f32 1.0, %v107_v41 }
 0x1d8   :  { %v109_v47 = vmul.f32 %v108_v44, %v108_v44 }
 0x1da   :  { %v110_v49 = vmul.f32 %v109_v47, %v37_v45 }
 0x1dc   :  { %v111_v50 = vmul.f32 %v110_v49, %v106_v48 }
 0x1de   :  { %112 = vadd.xlane.f32.xlu1 %v111_v50 }
 0x267   :  { %v113_v51 = vpop.xlane.xlu1 %112 }
 0x268   :  { %v114_v52 = vrot.slane %v113_v51, 4 }
 0x26a   :  { %v115_v53 = vadd.f32 %v114_v52, %v113_v51 }
 0x26c   :  { %v116_v54 = vrot.slane %v115_v53, 2 }
 0x26e   :  { %v117_v55 = vadd.f32 %v116_v54, %v115_v53 }
 0x270   :  { %v118_v56 = vrot.slane %v117_v55, 1 }
 0x272   :  { %v119_v57 = vadd.f32 %v118_v56, %v117_v55 }
 0x274   :  { %139 = vpush %v119_v57 }
 0x2a5   :  { %s140_s22 = spop %139 }
 0x2a6   :  { %v121_v58 = vstv %s140_s22 }
 0x2a7   :  { %122 = vst [vmem:[#allocation7] sm:$0xff] %v121_v58 }
 0x2a8   :  { %216 = shalt.err (!%p213_p0)
}
 0x2a9   :  { %132 = dma.vmem_to_hbm [thread:$0]  %s130_s21, 128, %s277_s2, [#allocation4]  }
 0x2aa   :  { %229 = dma.done.wait [#allocation4], 128  }
 0x2ab   :  { %230 = vsyncadd [#allocation4], 4294967168 }
 0x2ac   :  { %136 = vsyncpa [#allocation3], 1 }
 0x2ad   :  { %137 = vsyncpa [#allocation6], 1 }
 0x2ae   :  { %138 = vsyncpa [#allocation4], 1 }

</bundles_post_ra>
